<compile_context>
chip_gen: v6e
topology: v6e:2x2x1
jax: 0.10.0
libtpu: 0.0.40
codegen_flags: <defaults>
</compile_context>

<pallas_src>
import functools

import jax
import jax.numpy as jnp
from jax.experimental import pallas as pl
from jax.experimental.pallas import tpu as pltpu


def _round_up(x: int, m: int) -> int:
    return ((x + m - 1) // m) * m


def encoder_kernel(x_ref, w_ref, b_ref, o_ref):
    # x_ref: (TM, D_in_p)   w_ref: (D_in_p, TN)   b_ref: (1, TN)   o_ref: (TM, TN)
    y = jnp.dot(x_ref[...], w_ref[...], preferred_element_type=jnp.float32)
    y = y + b_ref[...]                       # bias broadcast over batch rows (f32)
    o_ref[...] = jnp.maximum(y, 0.0).astype(o_ref.dtype)


@functools.partial(jax.jit, static_argnames=("tm", "tn"))
def encoder_forward(x, w, b, *, tm: int = 256, tn: int = 512):
    """x: (B, D_in) f32, w: (D_in, D_emb) f32, b: (D_emb,) f32 -> (B, D_emb) f32."""
    B, D_in = x.shape
    D_emb = w.shape[1]

    # TPU-friendly padded extents: lane dims -> multiples of 128, batch -> 8.
    d_in_p = _round_up(D_in, 128)
    d_emb_p = _round_up(D_emb, 128)

    # Tile sizes (clamped to the padded problem so tiny shapes stay tiny).
    tm_eff = min(tm, _round_up(B, 8))
    tn_eff = min(tn, d_emb_p)
    b_pad = _round_up(B, tm_eff)
    d_emb_p = _round_up(d_emb_p, tn_eff)

    # Pad only when needed (aligned shapes pass straight through).
    if (b_pad, d_in_p) != (B, D_in):
        x = jnp.pad(x, ((0, b_pad - B), (0, d_in_p - D_in)))
    if (d_in_p, d_emb_p) != (D_in, D_emb):
        w = jnp.pad(w, ((0, d_in_p - D_in), (0, d_emb_p - D_emb)))
    b2 = b.reshape(1, D_emb)
    if d_emb_p != D_emb:
        b2 = jnp.pad(b2, ((0, 0), (0, d_emb_p - D_emb)))

    grid = (b_pad // tm_eff, d_emb_p // tn_eff)

    flops = 2 * b_pad * d_in_p * d_emb_p
    bytes_accessed = 4 * (b_pad * d_in_p + d_in_p * d_emb_p + d_emb_p
                          + b_pad * d_emb_p)

    out_p = pl.pallas_call(
        encoder_kernel,
        out_shape=jax.ShapeDtypeStruct((b_pad, d_emb_p), x.dtype),
        grid_spec=pl.GridSpec(
            grid=grid,
            in_specs=[
                # x: batch-tiled, full contraction dim in one pass.
                pl.BlockSpec((tm_eff, d_in_p), lambda i, j: (i, 0)),
                # W: column-tiled; constant over the batch axis -> stays
                # VMEM-resident while sweeping batch tiles.
                pl.BlockSpec((d_in_p, tn_eff), lambda i, j: (0, j)),
                # bias: column-tiled, VMEM-resident across batch tiles.
                pl.BlockSpec((1, tn_eff), lambda i, j: (0, j)),
            ],
            out_specs=pl.BlockSpec((tm_eff, tn_eff), lambda i, j: (i, j)),
        ),
        compiler_params=pltpu.CompilerParams(
            dimension_semantics=("parallel", "parallel"),
        ),
        cost_estimate=pl.CostEstimate(
            flops=flops, transcendentals=0, bytes_accessed=bytes_accessed
        ),
    )(x, w, b2)

    if (b_pad, d_emb_p) != (B, D_emb):
        out_p = out_p[:B, :D_emb]
    return out_p


if __name__ == "__main__":
    # Small shapes consistent with the nn.Module's 2-D Linear forward.
    batch = 8
    input_size = 32
    embedding_size = 16

    key = jax.random.PRNGKey(0)
    kx, kw, kb = jax.random.split(key, 3)

    # nn.Linear default init: uniform(-1/sqrt(fan_in), 1/sqrt(fan_in)).
    bound = 1.0 / (input_size ** 0.5)
    # PyTorch weight is (embedding_size, input_size); we store its transpose.
    w = jax.random.uniform(
        kw, (input_size, embedding_size), jnp.float32, minval=-bound, maxval=bound
    )
    b = jax.random.uniform(
        kb, (embedding_size,), jnp.float32, minval=-bound, maxval=bound
    )
    x = jax.random.normal(kx, (batch, input_size), jnp.float32)

    out = encoder_forward(x, w, b)
    jax.block_until_ready(out)

    # Sanity check against plain-JAX reference.
    ref = jnp.maximum(x @ w + b[None, :], 0.0)
    assert out.shape == (batch, embedding_size)
    assert jnp.allclose(out, ref, atol=1e-5, rtol=1e-5)

    print("KERNEL_OK")
</pallas_src>

<mosaic_0001>
module attributes {stable_mosaic.version = 11 : i64} {
  func.func @encoder_kernel(%arg0: i32, %arg1: i32, %arg2: memref<8x128xf32, #tpu.memory_space<vmem>>, %arg3: memref<128x128xf32, #tpu.memory_space<vmem>>, %arg4: memref<1x128xf32, #tpu.memory_space<vmem>>, %arg5: memref<8x128xf32, #tpu.memory_space<vmem>>) attributes {dimension_semantics = [#tpu.dimension_semantics<parallel>, #tpu.dimension_semantics<parallel>], iteration_bounds = array<i64: 1, 1>, scalar_prefetch = 0 : i64, scratch_operands = 0 : i64, tpu.core_type = #tpu.core_type<tc>, window_params = [{transform_indices = @transform_0, window_bounds = array<i64: 8, 128>}, {transform_indices = @transform_1, window_bounds = array<i64: 128, 128>}, {transform_indices = @transform_2, window_bounds = array<i64: 1, 128>}, {transform_indices = @transform_3, window_bounds = array<i64: 8, 128>}]} {
    %c0 = arith.constant 0 : index
    %c0_0 = arith.constant 0 : index
    %0 = vector.load %arg2[%c0, %c0_0] : memref<8x128xf32, #tpu.memory_space<vmem>>, vector<8x128xf32>
    %c0_1 = arith.constant 0 : index
    %c0_2 = arith.constant 0 : index
    %1 = vector.load %arg3[%c0_1, %c0_2] : memref<128x128xf32, #tpu.memory_space<vmem>>, vector<128x128xf32>
    %cst = arith.constant dense<0.000000e+00> : vector<8x128xf32>
    %2 = tpu.matmul %0, %1, %cst {dimension_numbers = #tpu.dot_dimension_numbers<[1], [0], [0], [1], [0, 0, 1, 1], [], []>} : vector<8x128xf32>, vector<128x128xf32>, vector<8x128xf32> -> vector<8x128xf32>
    %c0_3 = arith.constant 0 : index
    %c0_4 = arith.constant 0 : index
    %3 = vector.load %arg4[%c0_3, %c0_4] : memref<1x128xf32, #tpu.memory_space<vmem>>, vector<1x128xf32>
    %4 = vector.broadcast %3 : vector<1x128xf32> to vector<8x128xf32>
    %5 = arith.addf %2, %4 : vector<8x128xf32>
    %cst_5 = arith.constant 0.000000e+00 : f32
    %6 = vector.broadcast %cst_5 : f32 to vector<8x128xf32>
    %7 = arith.maximumf %5, %6 : vector<8x128xf32>
    %c0_6 = arith.constant 0 : index
    %c0_7 = arith.constant 0 : index
    %8 = vector.load %arg5[%c0_6, %c0_7] : memref<8x128xf32, #tpu.memory_space<vmem>>, vector<8x128xf32>
    tpu.vector_store %arg5[%c0_6, %c0_7], %7 {strides = array<i32>} : memref<8x128xf32, #tpu.memory_space<vmem>>, vector<8x128xf32>,
    return
  }
  func.func @transform_0(%arg0: i32, %arg1: i32) -> (i32, i32) {
    %c0_i32 = arith.constant 0 : i32
    %c0_i32_0 = arith.constant 0 : i32
    return %arg0, %c0_i32 : i32, i32
  }
  func.func @transform_1(%arg0: i32, %arg1: i32) -> (i32, i32) {
    %c0_i32 = arith.constant 0 : i32
    %c0_i32_0 = arith.constant 0 : i32
    return %c0_i32, %arg1 : i32, i32
  }
  func.func @transform_2(%arg0: i32, %arg1: i32) -> (i32, i32) {
    %c0_i32 = arith.constant 0 : i32
    %c0_i32_0 = arith.constant 0 : i32
    return %c0_i32, %arg1 : i32, i32
  }
  func.func @transform_3(%arg0: i32, %arg1: i32) -> (i32, i32) {
    %c0_i32 = arith.constant 0 : i32
    return %arg0, %arg1 : i32, i32
  }
}

</mosaic_0001>

<bundles_post_ra>
// kernel: encoder_forward.1
= control target key start
LH: loop header
LB: loop body
LE: loop exit
PB: predicated region body
PF: predicated region fallthrough
CT: control target
= control target key end

     0   :  { %v203_v1 = vmov 0.0   ;;  %vm204_vm0 = vmmov 0   ;;  %s283_s0 = inlined_call_operand.vmem [shape: f32[8,128], index: 0, kind: input, shape index: {}]   ;;  %s284_s1 = inlined_call_operand.vmem [shape: f32[128,128], index: 1, kind: input, shape index: {}]   ;;  %s285_s2 = inlined_call_operand.vmem [shape: f32[1,128], index: 2, kind: input, shape index: {}]   ;;  %s286_s3 = inlined_call_operand.hbm [shape: f32[8,128], index: 3, kind: output, shape index: {}]  }
   0x1   :  { %v31_v0 = vld [vmem:[%s284_s1 + $0x78] sm:$0xff]  ;;  %143 = vmatprep.subr.mxu0 %v203_v1  ;;  %v30_v2 = vld [vmem:[%s284_s1 + $0x70] sm:$0xff]  ;;  %175 = vmatprep.mubr.msk.f32.mxu0 %vm204_vm0, %v203_v1  ;;  %v29_v3 = vld [vmem:[%s284_s1 + $0x68] sm:$0xff] }
   0x2   :  { %144 = vmatpush3.msra.mxu0 %v31_v0  ;;  %v28_v4 = vld [vmem:[%s284_s1 + $0x60] sm:$0xff] }
   0x3   :  { %145 = vmatprep.subr.mxu0 %v203_v1 }
   0x4   :  { %146 = vmatpush3.msra.mxu0 %v30_v2 }
   0x5   :  { %147 = vmatprep.subr.mxu0 %v203_v1 }
   0x6   :  { %148 = vmatpush3.msra.mxu0 %v29_v3 }
   0x7   :  { %8 = vsyncpa [#allocation3], 0  ;;  %149 = vmatprep.subr.mxu0 %v203_v1  ;;  %v27_v5 = vld [vmem:[%s284_s1 + $0x58] sm:$0xff]  ;;  %v26_v6 = vld [vmem:[%s284_s1 + $0x50] sm:$0xff]  ;;  %s205_s21 = smov [#allocation2]  }
   0x8   :  { %150 = vmatpush3.msra.mxu0 %v28_v4  ;;  %v25_v7 = vld [vmem:[%s284_s1 + $0x48] sm:$0xff]  ;;  %v24_v8 = vld [vmem:[%s284_s1 + $0x40] sm:$0xff]  ;;  %v23_v9 = vld [vmem:[%s284_s1 + $0x38] sm:$0xff]  ;;  %s117_s22 = sshll.u32 %s205_s21, 4  ;;  %s118_s22 = int_to_ptr.vmem [resolvable:$true] %s117_s22 }
   0x9   :  { %151 = vmatprep.subr.mxu0 %v203_v1  ;;  %v22_v10 = vld [vmem:[%s284_s1 + $0x30] sm:$0xff]  ;;  %v21_v11 = vld [vmem:[%s284_s1 + $0x28] sm:$0xff]  ;;  %v20_v12 = vld [vmem:[%s284_s1 + $0x20] sm:$0xff]  ;;  %p186_p1 = scmp.lt.s32.totalorder %s118_s22, %s118_s22 }
   0xa   :  { %152 = vmatpush3.msra.mxu0 %v27_v5  ;;  %v19_v13 = vld [vmem:[%s284_s1 + $0x18] sm:$0xff]  ;;  %v18_v14 = vld [vmem:[%s284_s1 + $0x10] sm:$0xff]  ;;  %v17_v15 = vld [vmem:[%s284_s1 + $0x8] sm:$0xff] }
   0xb   :  { %153 = vmatprep.subr.mxu0 %v203_v1  ;;  %v16_v16 = vld [vmem:[%s284_s1] sm:$0xff]  ;;  %s181_s1 = scalar_lea.vmem %s118_s22, 128 }
   0xc   :  { %154 = vmatpush3.msra.mxu0 %v26_v6  ;;  %v15_v17 = vld [vmem:[%s283_s0] sm:$0xff]  ;;  %p182_p0 = scmp.ne.s32.totalorder %s118_s22, %s181_s1  ;;  %p187_p2 = scmp.lt.s32.totalorder %s181_s1, %s181_s1 }
   0xd   :  { %155 = vmatprep.subr.mxu0 %v203_v1  ;;  %v125_v18 = vld [vmem:[%s285_s2] ss:$0 sm:$0xff] }
   0xe   :  { %156 = vmatpush3.msra.mxu0 %v25_v7  ;;  %p188_p3 = por %p187_p2, %p186_p1 }
   0xf   :  { %157 = vmatprep.subr.mxu0 %v203_v1 }
  0x10   :  { %158 = vmatpush3.msra.mxu0 %v24_v8  ;;  %p189_p4 = pnand %p188_p3, %p182_p0 }
  0x11   :  { %159 = vmatprep.subr.mxu0 %v203_v1 }
  0x12   :  { %160 = vmatpush3.msra.mxu0 %v23_v9 }
  0x13   :  { %161 = vmatprep.subr.mxu0 %v203_v1 }
  0x14   :  { %162 = vmatpush3.msra.mxu0 %v22_v10 }
  0x15   :  { %163 = vmatprep.subr.mxu0 %v203_v1 }
  0x16   :  { %164 = vmatpush3.msra.mxu0 %v21_v11 }
  0x17   :  { %165 = vmatprep.subr.mxu0 %v203_v1 }
  0x18   :  { %166 = vmatpush3.msra.mxu0 %v20_v12 }
  0x19   :  { %167 = vmatprep.subr.mxu0 %v203_v1 }
  0x1a   :  { %168 = vmatpush3.msra.mxu0 %v19_v13 }
  0x1b   :  { %169 = vmatprep.subr.mxu0 %v203_v1 }
  0x1c   :  { %170 = vmatpush3.msra.mxu0 %v18_v14 }
  0x1d   :  { %171 = vmatprep.subr.mxu0 %v203_v1 }
  0x1e   :  { %172 = vmatpush3.msra.mxu0 %v17_v15 }
  0x1f   :  { %173 = vmatprep.subr.mxu0 %v203_v1 }
  0x20   :  { %174 = vmatpush3.msra.mxu0 %v16_v16 }
  0x21   :  { %176 = vmatmul.mubr.f32.vlgmr.msra.gmra.mxu0 %v15_v17 }
  0xe1   :  { %v105_v19 = vpop.f32.mrf.mxu0 }
  0xe2   :  { %v106_v20 = vadd.f32 %v125_v18, %v105_v19 }
  0xe3   :  { %v177_v21 = vpop.f32.mrf.mxu0 }
  0xe4   :  { %v109_v22 = vmax.f32 %v106_v20, 0.0 }
  0xe6   :  { %110 = vst [vmem:[#allocation2] sm:$0xff] %v109_v22 }
  0xe7   :  { %192 = shalt.err (!%p189_p4)
}
  0xe8   :  { %120 = dma.vmem_to_hbm [thread:$0]  %s118_s22, 128, %s286_s3, [#allocation3]  }
  0xe9   :  { %201 = dma.done.wait [#allocation3], 128  }
  0xea   :  { %202 = vsyncadd [#allocation3], 4294967168 }
  0xeb   :  { %124 = vsyncpa [#allocation3], 1 }

</bundles_post_ra>
